<compile_context>
chip_gen: v6e
topology: v6e:2x2x1
jax: 0.10.0
libtpu: 0.0.40
codegen_flags: <defaults>
</compile_context>

<pallas_src>
import functools

import jax
import jax.numpy as jnp
from jax.experimental import pallas as pl
from jax.experimental.pallas import tpu as pltpu

B = 1            # the PyTorch .view(1, 1, K, K) only works for batch == 1
HIDDEN = 64
IN_CH = 3
OUT_CH = 3
K = 3


# ----------------------------- fused kernel ----------------------------------
def _fused_kernel(x00_ref, w1_ref, b1_ref, w2_ref, b2_ref, w3_ref, b3_ref,
                  xsum_pad_ref, cw_ref, cb_ref, o_ref, spad_ref, *, h, w):
    # ---------------- MLP: (1, C) -> (1, K*K) dynamic 3x3 kernel -------------
    a = jnp.dot(x00_ref[...], w1_ref[...], preferred_element_type=jnp.float32)
    a = jnp.maximum(a + b1_ref[...], 0.0)
    a = jnp.dot(a, w2_ref[...], preferred_element_type=jnp.float32)
    a = jnp.maximum(a + b2_ref[...], 0.0)
    a = jnp.dot(a, w3_ref[...], preferred_element_type=jnp.float32)
    kw = jnp.maximum(a + b3_ref[...], 0.0)                      # (1, K*K)

    # -------- conv1: s = kw (*) sum_c x[c]   (input already zero-padded) -----
    s = jnp.zeros((h, w), jnp.float32)
    for i in range(K):
        for j in range(K):
            t = i * K + j
            s = s + kw[:, t:t + 1] * xsum_pad_ref[i:i + h, j:j + w]

    # Zero-pad s by 1 into the VMEM scratch for the second 3x3 conv.
    spad_ref[...] = jnp.zeros((h + 2, w + 2), jnp.float32)
    spad_ref[1:h + 1, 1:w + 1] = s

    # -------- conv2 (+ bias, + ReLU), weights pre-summed over in-channels ----
    cw = cw_ref[...]                                            # (O, K*K)
    cb = cb_ref[...]                                            # (1, O)
    for o in range(OUT_CH):
        acc = jnp.zeros((h, w), jnp.float32)
        for i in range(K):
            for j in range(K):
                t = i * K + j
                acc = acc + cw[o:o + 1, t:t + 1] * spad_ref[i:i + h, j:j + w]
        o_ref[o] = jnp.maximum(acc + cb[:, o:o + 1], 0.0)


# ------------------------------- wrapper --------------------------------------
@jax.jit
def convolutional_mlp_forward(x, mlp_params, conv_params):
    """x: (1, C, H, W) float32 NCHW -> (1, O, H, W) float32 NCHW."""
    b, c, h, w = x.shape
    assert b == 1 and c == IN_CH
    w1, b1, w2, b2, w3, b3 = mlp_params
    conv_w, conv_b = conv_params

    # Tiny wrapper-side prep (KB-sized, fuses into a single XLA op):
    x00 = x[:, :, 0, 0]                                          # (1, C)
    xsum_pad = jnp.pad(jnp.sum(x[0], axis=0), ((1, 1), (1, 1)))  # (H+2, W+2)
    cw = jnp.sum(conv_w, axis=1).reshape(OUT_CH, K * K)          # in-ch pre-summed
    cb = conv_b.reshape(1, OUT_CH)

    kern = functools.partial(_fused_kernel, h=h, w=w)
    out = pl.pallas_call(
        kern,
        out_shape=jax.ShapeDtypeStruct((OUT_CH, h, w), jnp.float32),
        scratch_shapes=[pltpu.VMEM((h + 2, w + 2), jnp.float32)],
    )(x00, w1, b1, w2, b2, w3, b3, xsum_pad, cw, cb)
    # TODO(synk): if H, W ever grow large, add a spatial grid axis marked
    # "parallel" and set pltpu.CompilerParams(vmem_limit_bytes=...) so the kernel
    # tiles under v7x's 64 MiB VMEM and shards across its 2 TensorCores.
    return out.reshape(1, OUT_CH, h, w)


# ------------------------------ params ----------------------------------------
def init_params(key):
    """Deterministic PyTorch-style (uniform +-1/sqrt(fan_in)) init."""
    ks = jax.random.split(key, 8)

    def lin(kw_, kb_, fan_in, fan_out):
        bound = 1.0 / jnp.sqrt(jnp.float32(fan_in))
        wgt = jax.random.uniform(kw_, (fan_in, fan_out), jnp.float32, -bound, bound)
        bia = jax.random.uniform(kb_, (1, fan_out), jnp.float32, -bound, bound)
        return wgt, bia

    w1, b1 = lin(ks[0], ks[1], IN_CH, HIDDEN)
    w2, b2 = lin(ks[2], ks[3], HIDDEN, HIDDEN)
    w3, b3 = lin(ks[4], ks[5], HIDDEN, K * K)

    fan = IN_CH * K * K
    bound = 1.0 / jnp.sqrt(jnp.float32(fan))
    conv_w = jax.random.uniform(ks[6], (OUT_CH, IN_CH, K, K), jnp.float32, -bound, bound)
    conv_b = jax.random.uniform(ks[7], (1, OUT_CH), jnp.float32, -bound, bound)
    return (w1, b1, w2, b2, w3, b3), (conv_w, conv_b)


# ------------------------- plain-JAX reference --------------------------------
def reference_forward(x, mlp_params, conv_params):
    w1, b1, w2, b2, w3, b3 = mlp_params
    conv_w, conv_b = conv_params
    x00 = x[:, :, 0, 0]
    h1 = jnp.maximum(x00 @ w1 + b1, 0.0)
    h2 = jnp.maximum(h1 @ w2 + b2, 0.0)
    kw9 = jnp.maximum(h2 @ w3 + b3, 0.0)                         # (1, K*K)
    kern = jnp.broadcast_to(kw9.reshape(1, 1, K, K), (OUT_CH, IN_CH, K, K))
    dn = ('NCHW', 'OIHW', 'NCHW')
    y = jax.lax.conv_general_dilated(x, kern, (1, 1), [(1, 1), (1, 1)],
                                     dimension_numbers=dn)
    y = jax.lax.conv_general_dilated(y, conv_w, (1, 1), [(1, 1), (1, 1)],
                                     dimension_numbers=dn)
    y = y + conv_b.reshape(1, OUT_CH, 1, 1)
    return jnp.maximum(y, 0.0)


if __name__ == "__main__":
    key = jax.random.PRNGKey(0)
    kp, kx = jax.random.split(key)
    mlp_params, conv_params = init_params(kp)

    H = W = 16
    x = jax.random.normal(kx, (B, IN_CH, H, W), jnp.float32)

    out = convolutional_mlp_forward(x, mlp_params, conv_params)
    out = jax.block_until_ready(out)

    ref = reference_forward(x, mlp_params, conv_params)
    assert out.shape == (B, OUT_CH, H, W), out.shape
    assert jnp.allclose(out, ref, atol=1e-4, rtol=1e-4), float(jnp.max(jnp.abs(out - ref)))
    print("KERNEL_OK")
</pallas_src>

<mosaic_0001>
module attributes {stable_mosaic.version = 11 : i64} {
  func.func @_fused_kernel(%arg0: memref<1x3xf32, #tpu.memory_space<vmem>>, %arg1: memref<3x64xf32, #tpu.memory_space<vmem>>, %arg2: memref<1x64xf32, #tpu.memory_space<vmem>>, %arg3: memref<64x64xf32, #tpu.memory_space<vmem>>, %arg4: memref<1x64xf32, #tpu.memory_space<vmem>>, %arg5: memref<64x9xf32, #tpu.memory_space<vmem>>, %arg6: memref<1x9xf32, #tpu.memory_space<vmem>>, %arg7: memref<18x18xf32, #tpu.memory_space<vmem>>, %arg8: memref<3x9xf32, #tpu.memory_space<vmem>>, %arg9: memref<1x3xf32, #tpu.memory_space<vmem>>, %arg10: memref<3x16x16xf32, #tpu.memory_space<vmem>>, %arg11: memref<18x18xf32, #tpu.memory_space<vmem>>) attributes {dimension_semantics = [], scalar_prefetch = 0 : i64, scratch_operands = 1 : i64, tpu.core_type = #tpu.core_type<tc>} {
    %c0 = arith.constant 0 : index
    %c0_0 = arith.constant 0 : index
    %0 = vector.load %arg0[%c0, %c0_0] : memref<1x3xf32, #tpu.memory_space<vmem>>, vector<1x3xf32>
    %c0_1 = arith.constant 0 : index
    %c0_2 = arith.constant 0 : index
    %1 = vector.load %arg1[%c0_1, %c0_2] : memref<3x64xf32, #tpu.memory_space<vmem>>, vector<3x64xf32>
    %cst = arith.constant dense<0.000000e+00> : vector<1x64xf32>
    %2 = tpu.matmul %0, %1, %cst {dimension_numbers = #tpu.dot_dimension_numbers<[1], [0], [0], [1], [0, 0, 1, 1], [], []>} : vector<1x3xf32>, vector<3x64xf32>, vector<1x64xf32> -> vector<1x64xf32>
    %c0_3 = arith.constant 0 : index
    %c0_4 = arith.constant 0 : index
    %3 = vector.load %arg2[%c0_3, %c0_4] : memref<1x64xf32, #tpu.memory_space<vmem>>, vector<1x64xf32>
    %4 = arith.addf %2, %3 : vector<1x64xf32>
    %cst_5 = arith.constant 0.000000e+00 : f32
    %5 = vector.broadcast %cst_5 : f32 to vector<1x64xf32>
    %6 = arith.maximumf %4, %5 : vector<1x64xf32>
    %c0_6 = arith.constant 0 : index
    %c0_7 = arith.constant 0 : index
    %7 = vector.load %arg3[%c0_6, %c0_7] : memref<64x64xf32, #tpu.memory_space<vmem>>, vector<64x64xf32>
    %cst_8 = arith.constant dense<0.000000e+00> : vector<1x64xf32>
    %8 = tpu.matmul %6, %7, %cst_8 {dimension_numbers = #tpu.dot_dimension_numbers<[1], [0], [0], [1], [0, 0, 1, 1], [], []>} : vector<1x64xf32>, vector<64x64xf32>, vector<1x64xf32> -> vector<1x64xf32>
    %c0_9 = arith.constant 0 : index
    %c0_10 = arith.constant 0 : index
    %9 = vector.load %arg4[%c0_9, %c0_10] : memref<1x64xf32, #tpu.memory_space<vmem>>, vector<1x64xf32>
    %10 = arith.addf %8, %9 : vector<1x64xf32>
    %cst_11 = arith.constant 0.000000e+00 : f32
    %11 = vector.broadcast %cst_11 : f32 to vector<1x64xf32>
    %12 = arith.maximumf %10, %11 : vector<1x64xf32>
    %c0_12 = arith.constant 0 : index
    %c0_13 = arith.constant 0 : index
    %13 = vector.load %arg5[%c0_12, %c0_13] : memref<64x9xf32, #tpu.memory_space<vmem>>, vector<64x9xf32>
    %cst_14 = arith.constant dense<0.000000e+00> : vector<1x9xf32>
    %14 = tpu.matmul %12, %13, %cst_14 {dimension_numbers = #tpu.dot_dimension_numbers<[1], [0], [0], [1], [0, 0, 1, 1], [], []>} : vector<1x64xf32>, vector<64x9xf32>, vector<1x9xf32> -> vector<1x9xf32>
    %c0_15 = arith.constant 0 : index
    %c0_16 = arith.constant 0 : index
    %15 = vector.load %arg6[%c0_15, %c0_16] : memref<1x9xf32, #tpu.memory_space<vmem>>, vector<1x9xf32>
    %16 = arith.addf %14, %15 : vector<1x9xf32>
    %cst_17 = arith.constant 0.000000e+00 : f32
    %17 = vector.broadcast %cst_17 : f32 to vector<1x9xf32>
    %18 = arith.maximumf %16, %17 : vector<1x9xf32>
    %cst_18 = arith.constant 0.000000e+00 : f32
    %19 = vector.broadcast %cst_18 : f32 to vector<16x16xf32>
    %20 = vector.extract_strided_slice %18 {offsets = [0, 0], sizes = [1, 1], strides = [1, 1]} : vector<1x9xf32> to vector<1x1xf32>
    %c0_19 = arith.constant 0 : index
    %c0_20 = arith.constant 0 : index
    %21 = vector.load %arg7[%c0_19, %c0_20] : memref<18x18xf32, #tpu.memory_space<vmem>>, vector<16x16xf32>
    %22 = vector.broadcast %20 : vector<1x1xf32> to vector<16x16xf32>
    %23 = arith.mulf %22, %21 : vector<16x16xf32>
    %24 = arith.addf %19, %23 : vector<16x16xf32>
    %25 = vector.extract_strided_slice %18 {offsets = [0, 1], sizes = [1, 1], strides = [1, 1]} : vector<1x9xf32> to vector<1x1xf32>
    %c0_21 = arith.constant 0 : index
    %c1 = arith.constant 1 : index
    %26 = vector.load %arg7[%c0_21, %c1] : memref<18x18xf32, #tpu.memory_space<vmem>>, vector<16x16xf32>
    %27 = vector.broadcast %25 : vector<1x1xf32> to vector<16x16xf32>
    %28 = arith.mulf %27, %26 : vector<16x16xf32>
    %29 = arith.addf %24, %28 : vector<16x16xf32>
    %30 = vector.extract_strided_slice %18 {offsets = [0, 2], sizes = [1, 1], strides = [1, 1]} : vector<1x9xf32> to vector<1x1xf32>
    %c0_22 = arith.constant 0 : index
    %c2 = arith.constant 2 : index
    %31 = vector.load %arg7[%c0_22, %c2] : memref<18x18xf32, #tpu.memory_space<vmem>>, vector<16x16xf32>
    %32 = vector.broadcast %30 : vector<1x1xf32> to vector<16x16xf32>
    %33 = arith.mulf %32, %31 : vector<16x16xf32>
    %34 = arith.addf %29, %33 : vector<16x16xf32>
    %35 = vector.extract_strided_slice %18 {offsets = [0, 3], sizes = [1, 1], strides = [1, 1]} : vector<1x9xf32> to vector<1x1xf32>
    %c1_23 = arith.constant 1 : index
    %c0_24 = arith.constant 0 : index
    %36 = vector.load %arg7[%c1_23, %c0_24] : memref<18x18xf32, #tpu.memory_space<vmem>>, vector<16x16xf32>
    %37 = vector.broadcast %35 : vector<1x1xf32> to vector<16x16xf32>
    %38 = arith.mulf %37, %36 : vector<16x16xf32>
    %39 = arith.addf %34, %38 : vector<16x16xf32>
    %40 = vector.extract_strided_slice %18 {offsets = [0, 4], sizes = [1, 1], strides = [1, 1]} : vector<1x9xf32> to vector<1x1xf32>
    %c1_25 = arith.constant 1 : index
    %c1_26 = arith.constant 1 : index
    %41 = vector.load %arg7[%c1_25, %c1_26] : memref<18x18xf32, #tpu.memory_space<vmem>>, vector<16x16xf32>
    %42 = vector.broadcast %40 : vector<1x1xf32> to vector<16x16xf32>
    %43 = arith.mulf %42, %41 : vector<16x16xf32>
    %44 = arith.addf %39, %43 : vector<16x16xf32>
    %45 = vector.extract_strided_slice %18 {offsets = [0, 5], sizes = [1, 1], strides = [1, 1]} : vector<1x9xf32> to vector<1x1xf32>
    %c1_27 = arith.constant 1 : index
    %c2_28 = arith.constant 2 : index
    %46 = vector.load %arg7[%c1_27, %c2_28] : memref<18x18xf32, #tpu.memory_space<vmem>>, vector<16x16xf32>
    %47 = vector.broadcast %45 : vector<1x1xf32> to vector<16x16xf32>
    %48 = arith.mulf %47, %46 : vector<16x16xf32>
    %49 = arith.addf %44, %48 : vector<16x16xf32>
    %50 = vector.extract_strided_slice %18 {offsets = [0, 6], sizes = [1, 1], strides = [1, 1]} : vector<1x9xf32> to vector<1x1xf32>
    %c2_29 = arith.constant 2 : index
    %c0_30 = arith.constant 0 : index
    %51 = vector.load %arg7[%c2_29, %c0_30] : memref<18x18xf32, #tpu.memory_space<vmem>>, vector<16x16xf32>
    %52 = vector.broadcast %50 : vector<1x1xf32> to vector<16x16xf32>
    %53 = arith.mulf %52, %51 : vector<16x16xf32>
    %54 = arith.addf %49, %53 : vector<16x16xf32>
    %55 = vector.extract_strided_slice %18 {offsets = [0, 7], sizes = [1, 1], strides = [1, 1]} : vector<1x9xf32> to vector<1x1xf32>
    %c2_31 = arith.constant 2 : index
    %c1_32 = arith.constant 1 : index
    %56 = vector.load %arg7[%c2_31, %c1_32] : memref<18x18xf32, #tpu.memory_space<vmem>>, vector<16x16xf32>
    %57 = vector.broadcast %55 : vector<1x1xf32> to vector<16x16xf32>
    %58 = arith.mulf %57, %56 : vector<16x16xf32>
    %59 = arith.addf %54, %58 : vector<16x16xf32>
    %60 = vector.extract_strided_slice %18 {offsets = [0, 8], sizes = [1, 1], strides = [1, 1]} : vector<1x9xf32> to vector<1x1xf32>
    %c2_33 = arith.constant 2 : index
    %c2_34 = arith.constant 2 : index
    %61 = vector.load %arg7[%c2_33, %c2_34] : memref<18x18xf32, #tpu.memory_space<vmem>>, vector<16x16xf32>
    %62 = vector.broadcast %60 : vector<1x1xf32> to vector<16x16xf32>
    %63 = arith.mulf %62, %61 : vector<16x16xf32>
    %64 = arith.addf %59, %63 : vector<16x16xf32>
    %cst_35 = arith.constant 0.000000e+00 : f32
    %65 = vector.broadcast %cst_35 : f32 to vector<18x18xf32>
    %c0_36 = arith.constant 0 : index
    %c0_37 = arith.constant 0 : index
    %66 = vector.load %arg11[%c0_36, %c0_37] : memref<18x18xf32, #tpu.memory_space<vmem>>, vector<18x18xf32>
    tpu.vector_store %arg11[%c0_36, %c0_37], %65 {strides = array<i32>} : memref<18x18xf32, #tpu.memory_space<vmem>>, vector<18x18xf32>,
    %c1_38 = arith.constant 1 : index
    %c1_39 = arith.constant 1 : index
    %67 = vector.load %arg11[%c1_38, %c1_39] : memref<18x18xf32, #tpu.memory_space<vmem>>, vector<16x16xf32>
    tpu.vector_store %arg11[%c1_38, %c1_39], %64 {strides = array<i32>} : memref<18x18xf32, #tpu.memory_space<vmem>>, vector<16x16xf32>,
    %c0_40 = arith.constant 0 : index
    %c0_41 = arith.constant 0 : index
    %68 = vector.load %arg8[%c0_40, %c0_41] : memref<3x9xf32, #tpu.memory_space<vmem>>, vector<3x9xf32>
    %c0_42 = arith.constant 0 : index
    %c0_43 = arith.constant 0 : index
    %69 = vector.load %arg9[%c0_42, %c0_43] : memref<1x3xf32, #tpu.memory_space<vmem>>, vector<1x3xf32>
    %cst_44 = arith.constant 0.000000e+00 : f32
    %70 = vector.broadcast %cst_44 : f32 to vector<16x16xf32>
    %71 = vector.extract_strided_slice %68 {offsets = [0, 0], sizes = [1, 1], strides = [1, 1]} : vector<3x9xf32> to vector<1x1xf32>
    %c0_45 = arith.constant 0 : index
    %c0_46 = arith.constant 0 : index
    %72 = vector.load %arg11[%c0_45, %c0_46] : memref<18x18xf32, #tpu.memory_space<vmem>>, vector<16x16xf32>
    %73 = vector.broadcast %71 : vector<1x1xf32> to vector<16x16xf32>
    %74 = arith.mulf %73, %72 : vector<16x16xf32>
    %75 = arith.addf %70, %74 : vector<16x16xf32>
    %76 = vector.extract_strided_slice %68 {offsets = [0, 1], sizes = [1, 1], strides = [1, 1]} : vector<3x9xf32> to vector<1x1xf32>
    %c0_47 = arith.constant 0 : index
    %c1_48 = arith.constant 1 : index
    %77 = vector.load %arg11[%c0_47, %c1_48] : memref<18x18xf32, #tpu.memory_space<vmem>>, vector<16x16xf32>
    %78 = vector.broadcast %76 : vector<1x1xf32> to vector<16x16xf32>
    %79 = arith.mulf %78, %77 : vector<16x16xf32>
    %80 = arith.addf %75, %79 : vector<16x16xf32>
    %81 = vector.extract_strided_slice %68 {offsets = [0, 2], sizes = [1, 1], strides = [1, 1]} : vector<3x9xf32> to vector<1x1xf32>
    %c0_49 = arith.constant 0 : index
    %c2_50 = arith.constant 2 : index
    %82 = vector.load %arg11[%c0_49, %c2_50] : memref<18x18xf32, #tpu.memory_space<vmem>>, vector<16x16xf32>
    %83 = vector.broadcast %81 : vector<1x1xf32> to vector<16x16xf32>
    %84 = arith.mulf %83, %82 : vector<16x16xf32>
    %85 = arith.addf %80, %84 : vector<16x16xf32>
    %86 = vector.extract_strided_slice %68 {offsets = [0, 3], sizes = [1, 1], strides = [1, 1]} : vector<3x9xf32> to vector<1x1xf32>
    %c1_51 = arith.constant 1 : index
    %c0_52 = arith.constant 0 : index
    %87 = vector.load %arg11[%c1_51, %c0_52] : memref<18x18xf32, #tpu.memory_space<vmem>>, vector<16x16xf32>
    %88 = vector.broadcast %86 : vector<1x1xf32> to vector<16x16xf32>
    %89 = arith.mulf %88, %87 : vector<16x16xf32>
    %90 = arith.addf %85, %89 : vector<16x16xf32>
    %91 = vector.extract_strided_slice %68 {offsets = [0, 4], sizes = [1, 1], strides = [1, 1]} : vector<3x9xf32> to vector<1x1xf32>
    %c1_53 = arith.constant 1 : index
    %c1_54 = arith.constant 1 : index
    %92 = vector.load %arg11[%c1_53, %c1_54] : memref<18x18xf32, #tpu.memory_space<vmem>>, vector<16x16xf32>
    %93 = vector.broadcast %91 : vector<1x1xf32> to vector<16x16xf32>
    %94 = arith.mulf %93, %92 : vector<16x16xf32>
    %95 = arith.addf %90, %94 : vector<16x16xf32>
    %96 = vector.extract_strided_slice %68 {offsets = [0, 5], sizes = [1, 1], strides = [1, 1]} : vector<3x9xf32> to vector<1x1xf32>
    %c1_55 = arith.constant 1 : index
    %c2_56 = arith.constant 2 : index
    %97 = vector.load %arg11[%c1_55, %c2_56] : memref<18x18xf32, #tpu.memory_space<vmem>>, vector<16x16xf32>
    %98 = vector.broadcast %96 : vector<1x1xf32> to vector<16x16xf32>
    %99 = arith.mulf %98, %97 : vector<16x16xf32>
    %100 = arith.addf %95, %99 : vector<16x16xf32>
    %101 = vector.extract_strided_slice %68 {offsets = [0, 6], sizes = [1, 1], strides = [1, 1]} : vector<3x9xf32> to vector<1x1xf32>
    %c2_57 = arith.constant 2 : index
    %c0_58 = arith.constant 0 : index
    %102 = vector.load %arg11[%c2_57, %c0_58] : memref<18x18xf32, #tpu.memory_space<vmem>>, vector<16x16xf32>
    %103 = vector.broadcast %101 : vector<1x1xf32> to vector<16x16xf32>
    %104 = arith.mulf %103, %102 : vector<16x16xf32>
    %105 = arith.addf %100, %104 : vector<16x16xf32>
    %106 = vector.extract_strided_slice %68 {offsets = [0, 7], sizes = [1, 1], strides = [1, 1]} : vector<3x9xf32> to vector<1x1xf32>
    %c2_59 = arith.constant 2 : index
    %c1_60 = arith.constant 1 : index
    %107 = vector.load %arg11[%c2_59, %c1_60] : memref<18x18xf32, #tpu.memory_space<vmem>>, vector<16x16xf32>
    %108 = vector.broadcast %106 : vector<1x1xf32> to vector<16x16xf32>
    %109 = arith.mulf %108, %107 : vector<16x16xf32>
    %110 = arith.addf %105, %109 : vector<16x16xf32>
    %111 = vector.extract_strided_slice %68 {offsets = [0, 8], sizes = [1, 1], strides = [1, 1]} : vector<3x9xf32> to vector<1x1xf32>
    %c2_61 = arith.constant 2 : index
    %c2_62 = arith.constant 2 : index
    %112 = vector.load %arg11[%c2_61, %c2_62] : memref<18x18xf32, #tpu.memory_space<vmem>>, vector<16x16xf32>
    %113 = vector.broadcast %111 : vector<1x1xf32> to vector<16x16xf32>
    %114 = arith.mulf %113, %112 : vector<16x16xf32>
    %115 = arith.addf %110, %114 : vector<16x16xf32>
    %116 = vector.extract_strided_slice %69 {offsets = [0, 0], sizes = [1, 1], strides = [1, 1]} : vector<1x3xf32> to vector<1x1xf32>
    %117 = vector.broadcast %116 : vector<1x1xf32> to vector<16x16xf32>
    %118 = arith.addf %115, %117 : vector<16x16xf32>
    %cst_63 = arith.constant 0.000000e+00 : f32
    %119 = vector.broadcast %cst_63 : f32 to vector<16x16xf32>
    %120 = arith.maximumf %118, %119 : vector<16x16xf32>
    %c0_64 = arith.constant 0 : index
    %c0_65 = arith.constant 0 : index
    %c0_66 = arith.constant 0 : index
    %121 = vector.load %arg10[%c0_64, %c0_65, %c0_66] : memref<3x16x16xf32, #tpu.memory_space<vmem>>, vector<1x16x16xf32>
    %122 = vector.shape_cast %121 : vector<1x16x16xf32> to vector<16x16xf32>
    %123 = vector.shape_cast %120 : vector<16x16xf32> to vector<1x16x16xf32>
    tpu.vector_store %arg10[%c0_64, %c0_65, %c0_66], %123 {strides = array<i32>} : memref<3x16x16xf32, #tpu.memory_space<vmem>>, vector<1x16x16xf32>,
    %cst_67 = arith.constant 0.000000e+00 : f32
    %124 = vector.broadcast %cst_67 : f32 to vector<16x16xf32>
    %125 = vector.extract_strided_slice %68 {offsets = [1, 0], sizes = [1, 1], strides = [1, 1]} : vector<3x9xf32> to vector<1x1xf32>
    %c0_68 = arith.constant 0 : index
    %c0_69 = arith.constant 0 : index
    %126 = vector.load %arg11[%c0_68, %c0_69] : memref<18x18xf32, #tpu.memory_space<vmem>>, vector<16x16xf32>
    %127 = vector.broadcast %125 : vector<1x1xf32> to vector<16x16xf32>
    %128 = arith.mulf %127, %126 : vector<16x16xf32>
    %129 = arith.addf %124, %128 : vector<16x16xf32>
    %130 = vector.extract_strided_slice %68 {offsets = [1, 1], sizes = [1, 1], strides = [1, 1]} : vector<3x9xf32> to vector<1x1xf32>
    %c0_70 = arith.constant 0 : index
    %c1_71 = arith.constant 1 : index
    %131 = vector.load %arg11[%c0_70, %c1_71] : memref<18x18xf32, #tpu.memory_space<vmem>>, vector<16x16xf32>
    %132 = vector.broadcast %130 : vector<1x1xf32> to vector<16x16xf32>
    %133 = arith.mulf %132, %131 : vector<16x16xf32>
    %134 = arith.addf %129, %133 : vector<16x16xf32>
    %135 = vector.extract_strided_slice %68 {offsets = [1, 2], sizes = [1, 1], strides = [1, 1]} : vector<3x9xf32> to vector<1x1xf32>
    %c0_72 = arith.constant 0 : index
    %c2_73 = arith.constant 2 : index
    %136 = vector.load %arg11[%c0_72, %c2_73] : memref<18x18xf32, #tpu.memory_space<vmem>>, vector<16x16xf32>
    %137 = vector.broadcast %135 : vector<1x1xf32> to vector<16x16xf32>
    %138 = arith.mulf %137, %136 : vector<16x16xf32>
    %139 = arith.addf %134, %138 : vector<16x16xf32>
    %140 = vector.extract_strided_slice %68 {offsets = [1, 3], sizes = [1, 1], strides = [1, 1]} : vector<3x9xf32> to vector<1x1xf32>
    %c1_74 = arith.constant 1 : index
    %c0_75 = arith.constant 0 : index
    %141 = vector.load %arg11[%c1_74, %c0_75] : memref<18x18xf32, #tpu.memory_space<vmem>>, vector<16x16xf32>
    %142 = vector.broadcast %140 : vector<1x1xf32> to vector<16x16xf32>
    %143 = arith.mulf %142, %141 : vector<16x16xf32>
    %144 = arith.addf %139, %143 : vector<16x16xf32>
    %145 = vector.extract_strided_slice %68 {offsets = [1, 4], sizes = [1, 1], strides = [1, 1]} : vector<3x9xf32> to vector<1x1xf32>
    %c1_76 = arith.constant 1 : index
    %c1_77 = arith.constant 1 : index
    %146 = vector.load %arg11[%c1_76, %c1_77] : memref<18x18xf32, #tpu.memory_space<vmem>>, vector<16x16xf32>
    %147 = vector.broadcast %145 : vector<1x1xf32> to vector<16x16xf32>
    %148 = arith.mulf %147, %146 : vector<16x16xf32>
    %149 = arith.addf %144, %148 : vector<16x16xf32>
    %150 = vector.extract_strided_slice %68 {offsets = [1, 5], sizes = [1, 1], strides = [1, 1]} : vector<3x9xf32> to vector<1x1xf32>
    %c1_78 = arith.constant 1 : index
    %c2_79 = arith.constant 2 : index
    %151 = vector.load %arg11[%c1_78, %c2_79] : memref<18x18xf32, #tpu.memory_space<vmem>>, vector<16x16xf32>
    %152 = vector.broadcast %150 : vector<1x1xf32> to vector<16x16xf32>
    %153 = arith.mulf %152, %151 : vector<16x16xf32>
    %154 = arith.addf %149, %153 : vector<16x16xf32>
    %155 = vector.extract_strided_slice %68 {offsets = [1, 6], sizes = [1, 1], strides = [1, 1]} : vector<3x9xf32> to vector<1x1xf32>
    %c2_80 = arith.constant 2 : index
    %c0_81 = arith.constant 0 : index
    %156 = vector.load %arg11[%c2_80, %c0_81] : memref<18x18xf32, #tpu.memory_space<vmem>>, vector<16x16xf32>
    %157 = vector.broadcast %155 : vector<1x1xf32> to vector<16x16xf32>
    %158 = arith.mulf %157, %156 : vector<16x16xf32>
    %159 = arith.addf %154, %158 : vector<16x16xf32>
    %160 = vector.extract_strided_slice %68 {offsets = [1, 7], sizes = [1, 1], strides = [1, 1]} : vector<3x9xf32> to vector<1x1xf32>
    %c2_82 = arith.constant 2 : index
    %c1_83 = arith.constant 1 : index
    %161 = vector.load %arg11[%c2_82, %c1_83] : memref<18x18xf32, #tpu.memory_space<vmem>>, vector<16x16xf32>
    %162 = vector.broadcast %160 : vector<1x1xf32> to vector<16x16xf32>
    %163 = arith.mulf %162, %161 : vector<16x16xf32>
    %164 = arith.addf %159, %163 : vector<16x16xf32>
    %165 = vector.extract_strided_slice %68 {offsets = [1, 8], sizes = [1, 1], strides = [1, 1]} : vector<3x9xf32> to vector<1x1xf32>
    %c2_84 = arith.constant 2 : index
    %c2_85 = arith.constant 2 : index
    %166 = vector.load %arg11[%c2_84, %c2_85] : memref<18x18xf32, #tpu.memory_space<vmem>>, vector<16x16xf32>
    %167 = vector.broadcast %165 : vector<1x1xf32> to vector<16x16xf32>
    %168 = arith.mulf %167, %166 : vector<16x16xf32>
    %169 = arith.addf %164, %168 : vector<16x16xf32>
    %170 = vector.extract_strided_slice %69 {offsets = [0, 1], sizes = [1, 1], strides = [1, 1]} : vector<1x3xf32> to vector<1x1xf32>
    %171 = vector.broadcast %170 : vector<1x1xf32> to vector<16x16xf32>
    %172 = arith.addf %169, %171 : vector<16x16xf32>
    %cst_86 = arith.constant 0.000000e+00 : f32
    %173 = vector.broadcast %cst_86 : f32 to vector<16x16xf32>
    %174 = arith.maximumf %172, %173 : vector<16x16xf32>
    %c1_87 = arith.constant 1 : index
    %c0_88 = arith.constant 0 : index
    %c0_89 = arith.constant 0 : index
    %175 = vector.load %arg10[%c1_87, %c0_88, %c0_89] : memref<3x16x16xf32, #tpu.memory_space<vmem>>, vector<1x16x16xf32>
    %176 = vector.shape_cast %175 : vector<1x16x16xf32> to vector<16x16xf32>
    %177 = vector.shape_cast %174 : vector<16x16xf32> to vector<1x16x16xf32>
    tpu.vector_store %arg10[%c1_87, %c0_88, %c0_89], %177 {strides = array<i32>} : memref<3x16x16xf32, #tpu.memory_space<vmem>>, vector<1x16x16xf32>,
    %cst_90 = arith.constant 0.000000e+00 : f32
    %178 = vector.broadcast %cst_90 : f32 to vector<16x16xf32>
    %179 = vector.extract_strided_slice %68 {offsets = [2, 0], sizes = [1, 1], strides = [1, 1]} : vector<3x9xf32> to vector<1x1xf32>
    %c0_91 = arith.constant 0 : index
    %c0_92 = arith.constant 0 : index
    %180 = vector.load %arg11[%c0_91, %c0_92] : memref<18x18xf32, #tpu.memory_space<vmem>>, vector<16x16xf32>
    %181 = vector.broadcast %179 : vector<1x1xf32> to vector<16x16xf32>
    %182 = arith.mulf %181, %180 : vector<16x16xf32>
    %183 = arith.addf %178, %182 : vector<16x16xf32>
    %184 = vector.extract_strided_slice %68 {offsets = [2, 1], sizes = [1, 1], strides = [1, 1]} : vector<3x9xf32> to vector<1x1xf32>
    %c0_93 = arith.constant 0 : index
    %c1_94 = arith.constant 1 : index
    %185 = vector.load %arg11[%c0_93, %c1_94] : memref<18x18xf32, #tpu.memory_space<vmem>>, vector<16x16xf32>
    %186 = vector.broadcast %184 : vector<1x1xf32> to vector<16x16xf32>
    %187 = arith.mulf %186, %185 : vector<16x16xf32>
    %188 = arith.addf %183, %187 : vector<16x16xf32>
    %189 = vector.extract_strided_slice %68 {offsets = [2, 2], sizes = [1, 1], strides = [1, 1]} : vector<3x9xf32> to vector<1x1xf32>
    %c0_95 = arith.constant 0 : index
    %c2_96 = arith.constant 2 : index
    %190 = vector.load %arg11[%c0_95, %c2_96] : memref<18x18xf32, #tpu.memory_space<vmem>>, vector<16x16xf32>
    %191 = vector.broadcast %189 : vector<1x1xf32> to vector<16x16xf32>
    %192 = arith.mulf %191, %190 : vector<16x16xf32>
    %193 = arith.addf %188, %192 : vector<16x16xf32>
    %194 = vector.extract_strided_slice %68 {offsets = [2, 3], sizes = [1, 1], strides = [1, 1]} : vector<3x9xf32> to vector<1x1xf32>
    %c1_97 = arith.constant 1 : index
    %c0_98 = arith.constant 0 : index
    %195 = vector.load %arg11[%c1_97, %c0_98] : memref<18x18xf32, #tpu.memory_space<vmem>>, vector<16x16xf32>
    %196 = vector.broadcast %194 : vector<1x1xf32> to vector<16x16xf32>
    %197 = arith.mulf %196, %195 : vector<16x16xf32>
    %198 = arith.addf %193, %197 : vector<16x16xf32>
    %199 = vector.extract_strided_slice %68 {offsets = [2, 4], sizes = [1, 1], strides = [1, 1]} : vector<3x9xf32> to vector<1x1xf32>
    %c1_99 = arith.constant 1 : index
    %c1_100 = arith.constant 1 : index
    %200 = vector.load %arg11[%c1_99, %c1_100] : memref<18x18xf32, #tpu.memory_space<vmem>>, vector<16x16xf32>
    %201 = vector.broadcast %199 : vector<1x1xf32> to vector<16x16xf32>
    %202 = arith.mulf %201, %200 : vector<16x16xf32>
    %203 = arith.addf %198, %202 : vector<16x16xf32>
    %204 = vector.extract_strided_slice %68 {offsets = [2, 5], sizes = [1, 1], strides = [1, 1]} : vector<3x9xf32> to vector<1x1xf32>
    %c1_101 = arith.constant 1 : index
    %c2_102 = arith.constant 2 : index
    %205 = vector.load %arg11[%c1_101, %c2_102] : memref<18x18xf32, #tpu.memory_space<vmem>>, vector<16x16xf32>
    %206 = vector.broadcast %204 : vector<1x1xf32> to vector<16x16xf32>
    %207 = arith.mulf %206, %205 : vector<16x16xf32>
    %208 = arith.addf %203, %207 : vector<16x16xf32>
    %209 = vector.extract_strided_slice %68 {offsets = [2, 6], sizes = [1, 1], strides = [1, 1]} : vector<3x9xf32> to vector<1x1xf32>
    %c2_103 = arith.constant 2 : index
    %c0_104 = arith.constant 0 : index
    %210 = vector.load %arg11[%c2_103, %c0_104] : memref<18x18xf32, #tpu.memory_space<vmem>>, vector<16x16xf32>
    %211 = vector.broadcast %209 : vector<1x1xf32> to vector<16x16xf32>
    %212 = arith.mulf %211, %210 : vector<16x16xf32>
    %213 = arith.addf %208, %212 : vector<16x16xf32>
    %214 = vector.extract_strided_slice %68 {offsets = [2, 7], sizes = [1, 1], strides = [1, 1]} : vector<3x9xf32> to vector<1x1xf32>
    %c2_105 = arith.constant 2 : index
    %c1_106 = arith.constant 1 : index
    %215 = vector.load %arg11[%c2_105, %c1_106] : memref<18x18xf32, #tpu.memory_space<vmem>>, vector<16x16xf32>
    %216 = vector.broadcast %214 : vector<1x1xf32> to vector<16x16xf32>
    %217 = arith.mulf %216, %215 : vector<16x16xf32>
    %218 = arith.addf %213, %217 : vector<16x16xf32>
    %219 = vector.extract_strided_slice %68 {offsets = [2, 8], sizes = [1, 1], strides = [1, 1]} : vector<3x9xf32> to vector<1x1xf32>
    %c2_107 = arith.constant 2 : index
    %c2_108 = arith.constant 2 : index
    %220 = vector.load %arg11[%c2_107, %c2_108] : memref<18x18xf32, #tpu.memory_space<vmem>>, vector<16x16xf32>
    %221 = vector.broadcast %219 : vector<1x1xf32> to vector<16x16xf32>
    %222 = arith.mulf %221, %220 : vector<16x16xf32>
    %223 = arith.addf %218, %222 : vector<16x16xf32>
    %224 = vector.extract_strided_slice %69 {offsets = [0, 2], sizes = [1, 1], strides = [1, 1]} : vector<1x3xf32> to vector<1x1xf32>
    %225 = vector.broadcast %224 : vector<1x1xf32> to vector<16x16xf32>
    %226 = arith.addf %223, %225 : vector<16x16xf32>
    %cst_109 = arith.constant 0.000000e+00 : f32
    %227 = vector.broadcast %cst_109 : f32 to vector<16x16xf32>
    %228 = arith.maximumf %226, %227 : vector<16x16xf32>
    %c2_110 = arith.constant 2 : index
    %c0_111 = arith.constant 0 : index
    %c0_112 = arith.constant 0 : index
    %229 = vector.load %arg10[%c2_110, %c0_111, %c0_112] : memref<3x16x16xf32, #tpu.memory_space<vmem>>, vector<1x16x16xf32>
    %230 = vector.shape_cast %229 : vector<1x16x16xf32> to vector<16x16xf32>
    %231 = vector.shape_cast %228 : vector<16x16xf32> to vector<1x16x16xf32>
    tpu.vector_store %arg10[%c2_110, %c0_111, %c0_112], %231 {strides = array<i32>} : memref<3x16x16xf32, #tpu.memory_space<vmem>>, vector<1x16x16xf32>,
    return
  }
}

</mosaic_0001>

<bundles_post_ra>
// kernel: convolutional_mlp_forward.1
= control target key start
LH: loop header
LB: loop body
LE: loop exit
PB: predicated region body
PF: predicated region fallthrough
CT: control target
= control target key end

     0   :  { %vm43_vm0 = vcmask 1042432   ;;  %vm39_vm1 = vcmask 23552   ;;  %v1076_v1 = vmov 0.0   ;;  %vm1077_vm2 = vmmov 0   ;;  %s1587_s0 = inlined_call_operand.vmem [shape: f32[1,3], index: 0, kind: input, shape index: {}]   ;;  %s1588_s1 = inlined_call_operand.vmem [shape: f32[3,64], index: 1, kind: input, shape index: {}]   ;;  %s1589_s2 = inlined_call_operand.vmem [shape: f32[1,64], index: 2, kind: input, shape index: {}]   ;;  %s1590_s3 = inlined_call_operand.vmem [shape: f32[64,64], index: 3, kind: input, shape index: {}]   ;;  %s1591_s4 = inlined_call_operand.vmem [shape: f32[1,64], index: 4, kind: input, shape index: {}]   ;;  %s1592_s5 = inlined_call_operand.vmem [shape: f32[64,9], index: 5, kind: input, shape index: {}]   ;;  %s1593_s6 = inlined_call_operand.vmem [shape: f32[1,9], index: 6, kind: input, shape index: {}]   ;;  %s1594_s7 = inlined_call_operand.vmem [shape: f32[18,18], index: 7, kind: input, shape index: {}]   ;;  %s1595_s8 = inlined_call_operand.vmem [shape: f32[3,9], index: 8, kind: input, shape index: {}]   ;;  %s1596_s9 = inlined_call_operand.vmem [shape: f32[1,3], index: 9, kind: input, shape index: {}]   ;;  %s1597_s10 = inlined_call_operand.hbm [shape: f32[3,16,16], index: 10, kind: output, shape index: {}]  }
   0x1   :  { %v37_v0 = vld [vmem:[%s1588_s1] sm:$0x7]  ;;  %918 = vmatprep.subr.mxu0 %v1076_v1  ;;  %920 = vmatprep.mubr.msk.f32.mxu0 %vm1077_vm2, %v1076_v1  ;;  %v125_v3 = vld [vmem:[%s1590_s3 + $0x38] sm:$0xff]  ;;  %v124_v4 = vld [vmem:[%s1590_s3 + $0x30] sm:$0xff] }
   0x2   :  { %v36_v2 = vld [vmem:[%s1587_s0] sm:$0x1]  ;;  %919 = vmatpush3.msk.msra.mxu0 %vm43_vm0, %v37_v0  ;;  %923 = vmatprep.subr.mxu1 %v1076_v1 }
   0x3   :  { %921 = vmatmul.mubr.msk.f32.vlgmr.msra.gmra.mxu0 %vm39_vm1, %v36_v2  ;;  %924 = vmatpush3.msra.mxu1 %v125_v3 }
   0x4   :  { %15 = vsyncpa [#allocation4], 0  ;;  %925 = vmatprep.subr.mxu1 %v1076_v1  ;;  %v123_v5 = vld [vmem:[%s1590_s3 + $0x28] sm:$0xff]  ;;  %939 = vmatprep.mubr.msk.f32.mxu1 %vm1077_vm2, %v1076_v1  ;;  %v122_v6 = vld [vmem:[%s1590_s3 + $0x20] sm:$0xff]  ;;  %vm127_vm3 = vcmask 523264   ;;  %s1079_s29 = smov 127  }
   0x5   :  { %926 = vmatpush3.msra.mxu1 %v124_v4  ;;  %942 = vmatprep.subr.mxu0 %v1076_v1  ;;  %v121_v7 = vld [vmem:[%s1590_s3 + $0x18] sm:$0xff]  ;;  %v120_v8 = vld [vmem:[%s1590_s3 + $0x10] sm:$0xff]  ;;  %v119_v9 = vld [vmem:[%s1590_s3 + $0x8] sm:$0xff]  ;;  %s1081_s30 = smov 126   ;;  %s1082_s11 = smov 122   ;;  %vm419_vm4 = vcmask 146432  }
   0x6   :  { %927 = vmatprep.subr.mxu1 %v1076_v1  ;;  %958 = vmatprep.mubr.msk.f32.mxu0 %vm1077_vm2, %v1076_v1  ;;  %v118_v10 = vld [vmem:[%s1590_s3] sm:$0xff]  ;;  %v209_v11 = vld [vmem:[%s1592_s5 + $0x38] sm:$0xff]  ;;  %v208_v12 = vld [vmem:[%s1592_s5 + $0x30] sm:$0xff]  ;;  %s1084_s12 = smov 120   ;;  %s1085_s13 = smov 121   ;;  %vm422_vm5 = vcmask 140288  }
   0x7   :  { %928 = vmatpush3.msra.mxu1 %v123_v5  ;;  %943 = vmatpush3.msra.mxu0 %v209_v11  ;;  %v207_v13 = vld [vmem:[%s1592_s5 + $0x28] sm:$0xff]  ;;  %v206_v14 = vld [vmem:[%s1592_s5 + $0x20] sm:$0xff]  ;;  %v205_v15 = vld [vmem:[%s1592_s5 + $0x18] sm:$0xff]  ;;  %421 = vst.msk [vmem:[#allocation2 + $0x8] sm:$0xff] %vm419_vm4, %v1076_v1  ;;  %vm432_vm6 = vcmask 138248   ;;  %vm584_vm7 = vcmask 130048  }
   0x8   :  { %929 = vmatprep.subr.mxu1 %v1076_v1  ;;  %944 = vmatprep.subr.mxu0 %v1076_v1  ;;  %v38_v16 = vld [vmem:[%s1589_s2] sm:$0x1]  ;;  %v204_v21 = vld [vmem:[%s1592_s5 + $0x10] sm:$0xff]  ;;  %v203_v22 = vld [vmem:[%s1592_s5 + $0x8] sm:$0xff]  ;;  %423 = vst.msk [vmem:[#allocation2 + $0x10] sm:$0x3] %vm422_vm5, %v1076_v1 }
   0x9   :  { %930 = vmatpush3.msra.mxu1 %v122_v6  ;;  %945 = vmatpush3.msra.mxu0 %v208_v12  ;;  %v202_v23 = vld [vmem:[%s1592_s5] sm:$0xff]  ;;  %s1078_s5 = smov 125   ;;  %v1277_v53 = vld [vmem:[%s1594_s7 + $0x8] sm:$0xff]  ;;  %420 = vst.msk [vmem:[#allocation2] sm:$0xff] %vm419_vm4, %v1076_v1 }
   0xa   :  { %931 = vmatprep.subr.mxu1 %v1076_v1  ;;  %946 = vmatprep.subr.mxu0 %v1076_v1  ;;  %v126_v24 = vld [vmem:[%s1591_s4] sm:$0x1]  ;;  %s1080_s4 = smov 124   ;;  %v329_v57 = vld [vmem:[%s1594_s7 + $0x1] sm:$0xff]  ;;  %v330_v58 = vld [vmem:[%s1594_s7 + $0x9] sm:$0xff] }
   0xb   :  { %932 = vmatpush3.msra.mxu1 %v121_v7  ;;  %947 = vmatpush3.msra.mxu0 %v207_v13  ;;  %v210_v29 = vld [vmem:[%s1593_s6] sm:$0x1]  ;;  %s1083_s6 = smov 123   ;;  %v374_v3 = vld [vmem:[%s1594_s7 + $0x2] sm:$0xff]  ;;  %v375_v4 = vld [vmem:[%s1594_s7 + $0xa] sm:$0xff] }
   0xc   :  { %933 = vmatprep.subr.mxu1 %v1076_v1  ;;  %948 = vmatprep.subr.mxu0 %v1076_v1  ;;  %v1247_v34 = vld [vmem:[%s1595_s8] sm:$0x7] }
   0xd   :  { %934 = vmatpush3.msra.mxu1 %v120_v8  ;;  %949 = vmatpush3.msra.mxu0 %v206_v14  ;;  %v589_v51 = vrot.slane %v1247_v34, 1  ;;  %v1272_v52 = vld [vmem:[%s1594_s7] sm:$0xff] }
   0xe   :  { %935 = vmatprep.subr.mxu1 %v1076_v1  ;;  %950 = vmatprep.subr.mxu0 %v1076_v1 }
   0xf   :  { %936 = vmatpush3.msra.mxu1 %v119_v9  ;;  %951 = vmatpush3.msra.mxu0 %v205_v15 }
  0x10   :  { %937 = vmatprep.subr.mxu1 %v1076_v1  ;;  %952 = vmatprep.subr.mxu0 %v1076_v1 }
  0x11   :  { %938 = vmatpush3.msra.mxu1 %v118_v10  ;;  %953 = vmatpush3.msra.mxu0 %v204_v21  ;;  %v1087_v21 = vmov 0  }
  0x12   :  { %954 = vmatprep.subr.mxu0 %v1076_v1  ;;  %1050 = vset.pattern.permute.xlu0 %v1087_v21 }
  0x13   :  { %955 = vmatpush3.msra.mxu0 %v203_v22 }
  0x14   :  { %956 = vmatprep.subr.mxu0 %v1076_v1 }
  0x15   :  { %957 = vmatpush3.msra.mxu0 %v202_v23 }
  0xc3   :  { %v113_v17 = vpop.f32.mrf.mxu0 }
  0xc4   :  { %v114_v18 = vadd.f32 %v113_v17, %v38_v16 }
  0xc5   :  { %v922_v19 = vpop.f32.mrf.mxu0 }
  0xc6   :  { %v117_v20 = vmax.f32 %v114_v18, 0.0  ;;  %v1324_v19 = vrot.slane %v1247_v34, 2 }
  0xc8   :  { %940 = vmatmul.mubr.msk.f32.vlgmr.msra.gmra.mxu1 %vm127_vm3, %v117_v20  ;;  %v1086_v20 = vmov 1  }
  0xc9   :  { %1051 = vset.pattern.permute.xlu1 %v1086_v20 }
 0x188   :  { %v197_v25 = vpop.f32.mrf.mxu1 }
 0x189   :  { %v198_v26 = vadd.f32 %v197_v25, %v126_v24 }
 0x18a   :  { %v941_v27 = vpop.f32.mrf.mxu1 }
 0x18b   :  { %v201_v28 = vmax.f32 %v198_v26, 0.0 }
 0x18d   :  { %959 = vmatmul.mubr.msk.f32.vlgmr.msra.gmra.mxu0 %vm127_vm3, %v201_v28 }
 0x24d   :  { %v280_v30 = vpop.f32.mrf.mxu0 }
 0x24e   :  { %v281_v31 = vadd.f32 %v280_v30, %v210_v29 }
 0x24f   :  { %v960_v32 = vpop.f32.mrf.mxu0 }
 0x250   :  { %v284_v33 = vmax.f32 %v281_v31, 0.0 }
 0x252   :  { %331 = vrot.lane.b32.xlu1 %v284_v33, %s1078_s5  ;;  %295 = vrot.lane.b32.xlu0 %v284_v33, %s1079_s29  ;;  %961 = vpush %v284_v33 }
 0x256   :  { %340 = vrot.lane.b32.xlu1 %v284_v33, %s1080_s4  ;;  %312 = vrot.lane.b32.xlu0 %v284_v33, %s1081_s30 }
 0x25a   :  { %376 = vrot.lane.b32.xlu1 %v284_v33, %s1082_s11  ;;  %357 = vrot.lane.b32.xlu0 %v284_v33, %s1083_s6 }
 0x25e   :  { %402 = vrot.lane.b32.xlu1 %v284_v33, %s1084_s12  ;;  %385 = vrot.lane.b32.xlu0 %v284_v33, %s1085_s13 }
 0x262   :  { %464 = vrot.lane.b32.xlu1 %v1247_v34, %s1081_s30  ;;  %447 = vrot.lane.b32.xlu0 %v1247_v34, %s1079_s29 }
 0x266   :  { %492 = vrot.lane.b32.xlu1 %v1247_v34, %s1080_s4  ;;  %483 = vrot.lane.b32.xlu0 %v1247_v34, %s1078_s5 }
 0x26a   :  { %528 = vrot.lane.b32.xlu1 %v1247_v34, %s1082_s11  ;;  %509 = vrot.lane.b32.xlu0 %v1247_v34, %s1083_s6 }
 0x26e   :  { %554 = vrot.lane.b32.xlu1 %v1247_v34, %s1084_s12  ;;  %537 = vrot.lane.b32.xlu0 %v1247_v34, %s1085_s13 }
 0x283   :  { %s1267_s8 = spop %961 }
 0x284   :  { %v289_v22 = vstv %s1267_s8 }
 0x285   :  { %v291_v25 = vmul.f32 %v289_v22, %v1272_v52  ;;  %v292_v26 = vmul.f32 %v289_v22, %v1277_v53 }
 0x2c4   :  { %v332_v35 = vpop.permute.xlu1 %331  ;;  %v296_v36 = vpop.permute.xlu0 %295 }
 0x2c5   :  { %963 = vpush %v296_v36 }
 0x2c8   :  { %v341_v37 = vpop.permute.xlu1 %340  ;;  %v313_v38 = vpop.permute.xlu0 %312 }
 0x2c9   :  { %965 = vpush %v313_v38 }
 0x2ca   :  { %967 = vpush %v332_v35 }
 0x2cb   :  { %969 = vpush %v341_v37 }
 0x2cc   :  { %v377_v39 = vpop.permute.xlu1 %376  ;;  %v358_v40 = vpop.permute.xlu0 %357 }
 0x2cd   :  { %971 = vpush %v358_v40 }
 0x2ce   :  { %973 = vpush %v377_v39 }
 0x2d0   :  { %v403_v41 = vpop.permute.xlu1 %402  ;;  %v386_v42 = vpop.permute.xlu0 %385 }
 0x2d1   :  { %975 = vpush %v386_v42 }
 0x2d2   :  { %977 = vpush %v403_v41 }
 0x2d3   :  { %979 = vpush %v1247_v34 }
 0x2d4   :  { %v465_v43 = vpop.permute.xlu1 %464  ;;  %v448_v44 = vpop.permute.xlu0 %447 }
 0x2d5   :  { %981 = vpush %v448_v44 }
 0x2d6   :  { %983 = vpush %v465_v43 }
 0x2d8   :  { %v493_v45 = vpop.permute.xlu1 %492  ;;  %v484_v46 = vpop.permute.xlu0 %483 }
 0x2d9   :  { %985 = vpush %v484_v46 }
 0x2da   :  { %987 = vpush %v493_v45 }
 0x2dc   :  { %v529_v47 = vpop.permute.xlu1 %528  ;;  %v510_v48 = vpop.permute.xlu0 %509 }
 0x2dd   :  { %989 = vpush %v510_v48 }
 0x2de   :  { %991 = vpush %v529_v47 }
 0x2e0   :  { %v555_v49 = vpop.permute.xlu1 %554  ;;  %v538_v50 = vpop.permute.xlu0 %537 }
 0x2e1   :  { %993 = vpush %v538_v50 }
 0x2e2   :  { %995 = vpush %v555_v49 }
 0x2e3   :  { %997 = vpush %v589_v51 }
 0x2f6   :  { %s964_s16 = spop %963 }
 0x2f7   :  { %v298_v54 = vstv %s964_s16 }
 0x2f8   :  { %v300_v55 = vmul.f32 %v298_v54, %v1272_v52  ;;  %v301_v56 = vmul.f32 %v298_v54, %v1277_v53  ;;  %v897_v54 = vld [vmem:[%s1596_s9] ss:$0 sm:$0xff] }
 0x2fa   :  { %s966_s19 = spop %965  ;;  %306 = vrot.lane.b32.xlu1 %v301_v56, %s1079_s29  ;;  %304 = vrot.lane.b32.xlu0 %v300_v55, %s1079_s29 }
 0x2fb   :  { %v315_v59 = vstv %s966_s19  ;;  %s968_s23 = spop %967 }
 0x2fc   :  { %v317_v60 = vmul.f32 %v315_v59, %v1272_v52  ;;  %v318_v61 = vmul.f32 %v315_v59, %v1277_v53  ;;  %v334_v62 = vstv %s968_s23  ;;  %s970_s2 = spop %969 }
 0x2fd   :  { %v1291_v63 = vmul.f32 %v334_v62, %v329_v57  ;;  %v1293_v0 = vmul.f32 %v334_v62, %v330_v58  ;;  %v343_v2 = vstv %s970_s2 }
 0x2fe   :  { %s972_s24 = spop %971  ;;  %323 = vrot.lane.b32.xlu1 %v318_v61, %s1081_s30  ;;  %321 = vrot.lane.b32.xlu0 %v317_v60, %s1081_s30  ;;  %v345_v5 = vmul.f32 %v343_v2, %v329_v57  ;;  %v346_v6 = vmul.f32 %v343_v2, %v330_v58 }
 0x2ff   :  { %s974_s14 = spop %973  ;;  %v360_v8 = vstv %s972_s24 }
 0x300   :  { %v379_v7 = vstv %s974_s14  ;;  %v362_v11 = vmul.f32 %v360_v8, %v329_v57  ;;  %v363_v12 = vmul.f32 %v360_v8, %v330_v58  ;;  %v1089_v57 = vmov 2  }
 0x301   :  { %v1303_v9 = vmul.f32 %v379_v7, %v374_v3  ;;  %v1305_v10 = vmul.f32 %v379_v7, %v375_v4 }
 0x302   :  { %s976_s15 = spop %975  ;;  %351 = vrot.lane.b32.xlu1 %v346_v6, %s1079_s29  ;;  %349 = vrot.lane.b32.xlu0 %v345_v5, %s1079_s29 }
 0x303   :  { %v388_v13 = vstv %s976_s15  ;;  %s978_s7 = spop %977 }
 0x304   :  { %v390_v14 = vmul.f32 %v388_v13, %v374_v3  ;;  %v391_v15 = vmul.f32 %v388_v13, %v375_v4  ;;  %v405_v16 = vstv %s978_s7  ;;  %s1356_s9 = spop %979 }
 0x305   :  { %v407_v17 = vmul.f32 %v405_v16, %v374_v3  ;;  %v408_v18 = vmul.f32 %v405_v16, %v375_v4 }
 0x306   :  { %368 = vrot.lane.b32.xlu1 %v363_v12, %s1081_s30  ;;  %366 = vrot.lane.b32.xlu0 %v362_v11, %s1081_s30 }
 0x30a   :  { %396 = vrot.lane.b32.xlu1 %v391_v15, %s1079_s29  ;;  %394 = vrot.lane.b32.xlu0 %v390_v14, %s1079_s29 }
 0x30e   :  { %413 = vrot.lane.b32.xlu1 %v408_v18, %s1081_s30  ;;  %411 = vrot.lane.b32.xlu0 %v407_v17, %s1081_s30 }
 0x312   :  { %614 = vrot.lane.b32.xlu1 %v589_v51, %s1081_s30  ;;  %597 = vrot.lane.b32.xlu0 %v589_v51, %s1079_s29 }
 0x316   :  { %642 = vrot.lane.b32.xlu1 %v589_v51, %s1080_s4  ;;  %633 = vrot.lane.b32.xlu0 %v589_v51, %s1078_s5 }
 0x31a   :  { %678 = vrot.lane.b32.xlu1 %v589_v51, %s1082_s11  ;;  %659 = vrot.lane.b32.xlu0 %v589_v51, %s1083_s6 }
 0x31e   :  { %704 = vrot.lane.b32.xlu1 %v589_v51, %s1084_s12  ;;  %687 = vrot.lane.b32.xlu0 %v589_v51, %s1085_s13 }
 0x322   :  { %759 = vrot.lane.b32.xlu1 %v1324_v19, %s1081_s30  ;;  %742 = vrot.lane.b32.xlu0 %v1324_v19, %s1079_s29 }
 0x326   :  { %787 = vrot.lane.b32.xlu1 %v1324_v19, %s1080_s4  ;;  %778 = vrot.lane.b32.xlu0 %v1324_v19, %s1078_s5  ;;  %s1088_s5 = smov 1  }
 0x32a   :  { %823 = vrot.lane.b32.xlu1 %v1324_v19, %s1082_s11  ;;  %804 = vrot.lane.b32.xlu0 %v1324_v19, %s1083_s6  ;;  %s1358_s6 = spop %981 }
 0x32e   :  { %849 = vrot.lane.b32.xlu1 %v1324_v19, %s1084_s12  ;;  %832 = vrot.lane.b32.xlu0 %v1324_v19, %s1085_s13  ;;  %s1360_s12 = spop %983 }
 0x32f   :  { %s1362_s13 = spop %985 }
 0x330   :  { %s1364_s8 = spop %987 }
 0x331   :  { %s1366_s16 = spop %989 }
 0x332   :  { %s1368_s3 = spop %991 }
 0x333   :  { %s1370_s17 = spop %993 }
 0x334   :  { %s1372_s18 = spop %995 }
 0x335   :  { %s1374_s1 = spop %997 }
 0x36c   :  { %v307_v23 = vpop.permute.xlu1 %306  ;;  %v305_v24 = vpop.permute.xlu0 %304 }
 0x36d   :  { %v311_v27 = vadd.f32 %v307_v23, %v292_v26  ;;  %v310_v28 = vadd.f32 %v305_v24, %v291_v25 }
 0x370   :  { %v324_v29 = vpop.permute.xlu1 %323  ;;  %v322_v30 = vpop.permute.xlu0 %321 }
 0x371   :  { %v328_v31 = vadd.f32 %v324_v29, %v311_v27  ;;  %v327_v32 = vadd.f32 %v322_v30, %v310_v28  ;;  %v450_v30 = vstv %s1358_s6 }
 0x373   :  { %v339_v33 = vadd.f32 %v1293_v0, %v328_v31  ;;  %v338_v34 = vadd.f32 %v1291_v63, %v327_v32  ;;  %v441_v31 = vstv %s1356_s9 }
 0x374   :  { %v352_v35 = vpop.permute.xlu1 %351  ;;  %v350_v36 = vpop.permute.xlu0 %349 }
 0x375   :  { %v356_v1 = vadd.f32 %v352_v35, %v339_v33  ;;  %v355_v37 = vadd.f32 %v350_v36, %v338_v34  ;;  %v467_v34 = vstv %s1360_s12  ;;  %v486_v35 = vstv %s1362_s13 }
 0x376   :  { %v531_v36 = vstv %s1368_s3 }
 0x378   :  { %v369_v38 = vpop.permute.xlu1 %368  ;;  %v367_v39 = vpop.permute.xlu0 %366 }
 0x379   :  { %v373_v40 = vadd.f32 %v369_v38, %v356_v1  ;;  %v372_v41 = vadd.f32 %v367_v39, %v355_v37 }
 0x37b   :  { %v384_v42 = vadd.f32 %v1305_v10, %v373_v40  ;;  %v383_v43 = vadd.f32 %v1303_v9, %v372_v41 }
 0x37c   :  { %v397_v44 = vpop.permute.xlu1 %396  ;;  %v395_v45 = vpop.permute.xlu0 %394 }
 0x37d   :  { %v401_v46 = vadd.f32 %v397_v44, %v384_v42  ;;  %v400_v47 = vadd.f32 %v395_v45, %v383_v43 }
 0x380   :  { %v414_v48 = vpop.permute.xlu1 %413  ;;  %v412_v49 = vpop.permute.xlu0 %411 }
 0x381   :  { %v418_v50 = vadd.f32 %v414_v48, %v401_v46  ;;  %v417_v51 = vadd.f32 %v412_v49, %v400_v47 }
 0x383   :  { %428 = vrot.lane.b32.xlu1 %v418_v50, %s1088_s5  ;;  %426 = vrot.lane.b32.xlu0 %v417_v51, %s1088_s5 }
 0x384   :  { %v615_v52 = vpop.permute.xlu1 %614  ;;  %v598_v53 = vpop.permute.xlu0 %597 }
 0x385   :  { %999 = vpush %v598_v53 }
 0x386   :  { %1001 = vpush %v615_v52 }
 0x387   :  { %722 = vperm.xlu1 %1051, %v897_v54   ;;  %577 = vperm.xlu0 %1050, %v897_v54  }
 0x388   :  { %v643_v55 = vpop.permute.xlu1 %642  ;;  %v634_v56 = vpop.permute.xlu0 %633 }
 0x389   :  { %1003 = vpush %v634_v56  ;;  %v495_v56 = vstv %s1364_s8 }
 0x38a   :  { %1005 = vpush %v643_v55 }
 0x38b   :  { %1052 = vset.pattern.permute.xlu1 %v1089_v57  ;;  %1053 = vset.pattern.permute.xlu0 %v1089_v57 }
 0x38c   :  { %v679_v58 = vpop.permute.xlu1 %678  ;;  %v660_v59 = vpop.permute.xlu0 %659  ;;  %867 = vperm.xlu1 %1052, %v897_v54  }
 0x38d   :  { %1007 = vpush %v660_v59 }
 0x38e   :  { %1009 = vpush %v679_v58 }
 0x390   :  { %v705_v60 = vpop.permute.xlu1 %704  ;;  %v688_v61 = vpop.permute.xlu0 %687 }
 0x391   :  { %1011 = vpush %v688_v61 }
 0x392   :  { %1013 = vpush %v705_v60 }
 0x393   :  { %1015 = vpush %v1324_v19 }
 0x394   :  { %v760_v62 = vpop.permute.xlu1 %759  ;;  %v743_v63 = vpop.permute.xlu0 %742 }
 0x395   :  { %1017 = vpush %v743_v63 }
 0x396   :  { %1019 = vpush %v760_v62 }
 0x398   :  { %v788_v0 = vpop.permute.xlu1 %787  ;;  %v779_v2 = vpop.permute.xlu0 %778 }
 0x399   :  { %1021 = vpush %v779_v2  ;;  %v512_v2 = vstv %s1366_s16 }
 0x39a   :  { %1023 = vpush %v788_v0 }
 0x39c   :  { %v824_v3 = vpop.permute.xlu1 %823  ;;  %v805_v4 = vpop.permute.xlu0 %804 }
 0x39d   :  { %1025 = vpush %v805_v4 }
 0x39e   :  { %1027 = vpush %v824_v3 }
 0x3a0   :  { %v850_v5 = vpop.permute.xlu1 %849  ;;  %v833_v6 = vpop.permute.xlu0 %832 }
 0x3a1   :  { %1029 = vpush %v833_v6 }
 0x3a2   :  { %1031 = vpush %v850_v5 }
 0x3b6   :  { %s1376_s19 = spop %999 }
 0x3b7   :  { %s1378_s20 = spop %1001  ;;  %v600_v1 = vstv %s1376_s19 }
 0x3b8   :  { %v617_v50 = vstv %s1378_s20 }
 0x3ba   :  { %s1004_s21 = spop %1003 }
 0x3bb   :  { %s1380_s0 = spop %1005  ;;  %v636_v12 = vstv %s1004_s21 }
 0x3bc   :  { %v645_v59 = vstv %s1380_s0 }
 0x3be   :  { %s1382_s22 = spop %1007 }
 0x3bf   :  { %s1010_s23 = spop %1009  ;;  %v662_v5 = vstv %s1382_s22 }
 0x3c0   :  { %v681_v13 = vstv %s1010_s23 }
 0x3c2   :  { %s1384_s2 = spop %1011 }
 0x3c3   :  { %s1386_s24 = spop %1013 }
 0x3c4   :  { %s1016_s25 = spop %1015 }
 0x3c5   :  { %v736_v18 = vstv %s1016_s25 }
 0x3c6   :  { %s1388_s26 = spop %1017 }
 0x3c7   :  { %s1390_s27 = spop %1019  ;;  %v745_v42 = vstv %s1388_s26 }
 0x3c8   :  { %v762_v53 = vstv %s1390_s27 }
 0x3ca   :  { %s1022_s28 = spop %1021 }
 0x3cb   :  { %s1392_s14 = spop %1023  ;;  %v781_v22 = vstv %s1022_s28 }
 0x3cc   :  { %v790_v62 = vstv %s1392_s14 }
 0x3ce   :  { %s1394_s15 = spop %1025 }
 0x3cf   :  { %s1028_s7 = spop %1027 }
 0x3d0   :  { %v826_v25 = vstv %s1028_s7 }
 0x3d2   :  { %s1030_s5 = spop %1029 }
 0x3d3   :  { %s1032_s4 = spop %1031 }
 0x3f5   :  { %v429_v7 = vpop.permute.xlu1 %428  ;;  %v427_v8 = vpop.permute.xlu0 %426 }
 0x3f6   :  { %434 = vst.msk [vmem:[#allocation2 + $0x9] sm:$0xff] %vm432_vm6, %v429_v7  ;;  %433 = vst.msk [vmem:[#allocation2 + $0x1] sm:$0xff] %vm432_vm6, %v427_v8  ;;  %v807_v8 = vstv %s1394_s15 }
 0x3fd   :  { %v1396_v9 = vld [vmem:[#allocation2] sm:$0xff]  ;;  %v1398_v10 = vld [vmem:[#allocation2 + $0x8] sm:$0xff] }
 0x3fe   :  { %v1400_v11 = vld [vmem:[#allocation2 + $0x1] sm:$0xff]  ;;  %v1402_v14 = vld [vmem:[#allocation2 + $0x9] sm:$0xff]  ;;  %v1421_v23 = vmul.f32 %v736_v18, %v1396_v9  ;;  %v1424_v24 = vmul.f32 %v736_v18, %v1398_v10  ;;  %v453_v32 = vmul.f32 %v1398_v10, %v450_v30  ;;  %v452_v33 = vmul.f32 %v1396_v9, %v450_v30 }
 0x3ff   :  { %v1405_v15 = vmul.f32 %v636_v12, %v1400_v11  ;;  %v1407_v16 = vld [vmem:[#allocation2 + $0x2] sm:$0xff]  ;;  %v1409_v17 = vld [vmem:[#allocation2 + $0xa] sm:$0xff]  ;;  %v1412_v19 = vmul.f32 %v636_v12, %v1402_v14  ;;  %v1427_v26 = vmul.f32 %v781_v22, %v1400_v11  ;;  %v1430_v27 = vmul.f32 %v781_v22, %v1402_v14 }
 0x400   :  { %v1415_v20 = vmul.f32 %v681_v13, %v1407_v16  ;;  %v1418_v21 = vmul.f32 %v681_v13, %v1409_v17  ;;  %v1433_v28 = vmul.f32 %v826_v25, %v1407_v16  ;;  %v1436_v29 = vmul.f32 %v826_v25, %v1409_v17  ;;  %458 = vrot.lane.b32.xlu1 %v453_v32, %s1079_s29 }
 0x401   :  { %456 = vrot.lane.b32.xlu0 %v452_v33, %s1079_s29  ;;  %v1449_v37 = vmul.f32 %v1398_v10, %v441_v31  ;;  %v602_v38 = vmul.f32 %v600_v1, %v1396_v9  ;;  %v469_v39 = vmul.f32 %v1396_v9, %v467_v34  ;;  %v1454_v40 = vmul.f32 %v1396_v9, %v441_v31 }
 0x402   :  { %v1457_v41 = vmul.f32 %v1402_v14, %v486_v35  ;;  %v1461_v43 = vmul.f32 %v1400_v11, %v486_v35  ;;  %v1464_v44 = vmul.f32 %v1409_v17, %v531_v36  ;;  %v1467_v45 = vmul.f32 %v1407_v16, %v531_v36 }
 0x403   :  { %v747_v46 = vmul.f32 %v745_v42, %v1396_v9  ;;  %v603_v47 = vmul.f32 %v600_v1, %v1398_v10  ;;  %v748_v48 = vmul.f32 %v745_v42, %v1398_v10  ;;  %v470_v49 = vmul.f32 %v1398_v10, %v467_v34 }
 0x404   :  { %606 = vrot.lane.b32.xlu1 %v602_v38, %s1079_s29  ;;  %v619_v51 = vmul.f32 %v617_v50, %v1396_v9  ;;  %v620_v52 = vmul.f32 %v617_v50, %v1398_v10  ;;  %v764_v54 = vmul.f32 %v762_v53, %v1396_v9  ;;  %v765_v55 = vmul.f32 %v762_v53, %v1398_v10  ;;  %v1551_v50 = vpop.permute.xlu0 %577 }
 0x405   :  { %473 = vrot.lane.b32.xlu0 %v469_v39, %s1081_s30  ;;  %v498_v57 = vmul.f32 %v1402_v14, %v495_v56  ;;  %v497_v58 = vmul.f32 %v1400_v11, %v495_v56  ;;  %v647_v60 = vmul.f32 %v645_v59, %v1400_v11  ;;  %v648_v61 = vmul.f32 %v645_v59, %v1402_v14 }
 0x406   :  { %v792_v63 = vmul.f32 %v790_v62, %v1400_v11  ;;  %v793_v0 = vmul.f32 %v790_v62, %v1402_v14  ;;  %v515_v3 = vmul.f32 %v1402_v14, %v512_v2  ;;  %v514_v4 = vmul.f32 %v1400_v11, %v512_v2 }
 0x407   :  { %v664_v6 = vmul.f32 %v662_v5, %v1400_v11  ;;  %v665_v7 = vmul.f32 %v662_v5, %v1402_v14  ;;  %v809_v12 = vmul.f32 %v807_v8, %v1400_v11  ;;  %v810_v13 = vmul.f32 %v807_v8, %v1402_v14 }
 0x408   :  { %751 = vrot.lane.b32.xlu1 %v747_v46, %s1079_s29  ;;  %v540_v18 = vstv %s1370_s17  ;;  %v690_v30 = vstv %s1384_s2  ;;  %v835_v31 = vstv %s1030_s5 }
 0x409   :  { %608 = vrot.lane.b32.xlu0 %v603_v47, %s1079_s29  ;;  %v543_v22 = vmul.f32 %v1409_v17, %v540_v18  ;;  %v542_v25 = vmul.f32 %v1407_v16, %v540_v18  ;;  %v692_v11 = vmul.f32 %v690_v30, %v1407_v16  ;;  %v693_v14 = vmul.f32 %v690_v30, %v1409_v17 }
 0x40a   :  { %v837_v32 = vmul.f32 %v835_v31, %v1407_v16  ;;  %v838_v33 = vmul.f32 %v835_v31, %v1409_v17  ;;  %v557_v34 = vstv %s1372_s18  ;;  %v707_v1 = vstv %s1386_s24 }
 0x40b   :  { %v560_v35 = vmul.f32 %v1409_v17, %v557_v34  ;;  %v559_v36 = vmul.f32 %v1407_v16, %v557_v34  ;;  %v709_v38 = vmul.f32 %v707_v1, %v1407_v16  ;;  %v710_v39 = vmul.f32 %v707_v1, %v1409_v17 }
 0x40c   :  { %475 = vrot.lane.b32.xlu1 %v470_v49, %s1081_s30  ;;  %v852_v42 = vstv %s1032_s4 }
 0x40d   :  { %753 = vrot.lane.b32.xlu0 %v748_v48, %s1079_s29  ;;  %v854_v46 = vmul.f32 %v852_v42, %v1407_v16  ;;  %v855_v47 = vmul.f32 %v852_v42, %v1409_v17  ;;  %v1547_v48 = vpop.permute.xlu1 %722 }
 0x410   :  { %625 = vrot.lane.b32.xlu1 %v620_v52, %s1081_s30 }
 0x411   :  { %623 = vrot.lane.b32.xlu0 %v619_v51, %s1081_s30  ;;  %v1549_v49 = vpop.permute.xlu1 %867 }
 0x414   :  { %770 = vrot.lane.b32.xlu1 %v765_v55, %s1081_s30 }
 0x415   :  { %768 = vrot.lane.b32.xlu0 %v764_v54, %s1081_s30 }
 0x418   :  { %503 = vrot.lane.b32.xlu1 %v498_v57, %s1079_s29 }
 0x419   :  { %501 = vrot.lane.b32.xlu0 %v497_v58, %s1079_s29  ;;  %v591_v58 = vstv %s1374_s1 }
 0x41a   :  { %v593_v62 = vmul.f32 %v591_v58, %v1396_v9 }
 0x41c   :  { %653 = vrot.lane.b32.xlu1 %v648_v61, %s1079_s29 }
 0x41d   :  { %651 = vrot.lane.b32.xlu0 %v647_v60, %s1079_s29 }
 0x420   :  { %798 = vrot.lane.b32.xlu1 %v793_v0, %s1079_s29 }
 0x421   :  { %796 = vrot.lane.b32.xlu0 %v792_v63, %s1079_s29  ;;  %v594_v63 = vmul.f32 %v591_v58, %v1398_v10 }
 0x424   :  { %520 = vrot.lane.b32.xlu1 %v515_v3, %s1081_s30 }
 0x425   :  { %518 = vrot.lane.b32.xlu0 %v514_v4, %s1081_s30 }
 0x428   :  { %670 = vrot.lane.b32.xlu1 %v665_v7, %s1081_s30 }
 0x429   :  { %668 = vrot.lane.b32.xlu0 %v664_v6, %s1081_s30 }
 0x42c   :  { %815 = vrot.lane.b32.xlu1 %v810_v13, %s1081_s30 }
 0x42d   :  { %813 = vrot.lane.b32.xlu0 %v809_v12, %s1081_s30 }
 0x430   :  { %548 = vrot.lane.b32.xlu1 %v543_v22, %s1079_s29 }
 0x431   :  { %546 = vrot.lane.b32.xlu0 %v542_v25, %s1079_s29 }
 0x434   :  { %698 = vrot.lane.b32.xlu1 %v693_v14, %s1079_s29 }
 0x435   :  { %696 = vrot.lane.b32.xlu0 %v692_v11, %s1079_s29 }
 0x438   :  { %843 = vrot.lane.b32.xlu1 %v838_v33, %s1079_s29 }
 0x439   :  { %841 = vrot.lane.b32.xlu0 %v837_v32, %s1079_s29  ;;  %s1090_s29 = smov [#allocation3]  }
 0x43c   :  { %565 = vrot.lane.b32.xlu1 %v560_v35, %s1081_s30 }
 0x43d   :  { %563 = vrot.lane.b32.xlu0 %v559_v36, %s1081_s30 }
 0x440   :  { %715 = vrot.lane.b32.xlu1 %v710_v39, %s1081_s30 }
 0x441   :  { %713 = vrot.lane.b32.xlu0 %v709_v38, %s1081_s30 }
 0x444   :  { %860 = vrot.lane.b32.xlu1 %v855_v47, %s1081_s30 }
 0x445   :  { %858 = vrot.lane.b32.xlu0 %v854_v46, %s1081_s30  ;;  %s882_s30 = sshll.u32 %s1090_s29, 4  ;;  %s883_s30 = int_to_ptr.vmem [resolvable:$true] %s882_s30 }
 0x446   :  { %s1054_s11 = scalar_lea.vmem %s883_s30, 768  ;;  %p1059_p1 = scmp.lt.s32.totalorder %s883_s30, %s883_s30 }
 0x447   :  { %p1055_p0 = scmp.ne.s32.totalorder %s883_s30, %s1054_s11  ;;  %p1060_p2 = scmp.lt.s32.totalorder %s1054_s11, %s1054_s11 }
 0x449   :  { %p1061_p3 = por %p1060_p2, %p1059_p1 }
 0x44b   :  { %p1062_p4 = pnand %p1061_p3, %p1055_p0 }
 0x472   :  { %v459_v51 = vpop.permute.xlu1 %458 }
 0x473   :  { %v457_v52 = vpop.permute.xlu0 %456  ;;  %v463_v59 = vadd.f32 %v459_v51, %v1449_v37 }
 0x474   :  { %v462_v53 = vadd.f32 %v457_v52, %v1454_v40 }
 0x476   :  { %v607_v54 = vpop.permute.xlu1 %606 }
 0x477   :  { %v474_v55 = vpop.permute.xlu0 %473  ;;  %v612_v2 = vadd.f32 %v607_v54, %v593_v62 }
 0x478   :  { %v479_v16 = vadd.f32 %v474_v55, %v462_v53 }
 0x47a   :  { %v490_v56 = vadd.f32 %v1461_v43, %v479_v16  ;;  %v752_v17 = vpop.permute.xlu1 %751 }
 0x47b   :  { %v609_v57 = vpop.permute.xlu0 %608  ;;  %v757_v7 = vadd.f32 %v752_v17, %v1421_v23 }
 0x47c   :  { %v613_v3 = vadd.f32 %v609_v57, %v594_v63 }
 0x47e   :  { %v476_v60 = vpop.permute.xlu1 %475 }
 0x47f   :  { %v754_v61 = vpop.permute.xlu0 %753  ;;  %v480_v0 = vadd.f32 %v476_v60, %v463_v59 }
 0x480   :  { %v758_v8 = vadd.f32 %v754_v61, %v1424_v24 }
 0x481   :  { %v491_v40 = vadd.f32 %v1457_v41, %v480_v0 }
 0x482   :  { %v626_v4 = vpop.permute.xlu1 %625 }
 0x483   :  { %v624_v5 = vpop.permute.xlu0 %623  ;;  %v630_v6 = vadd.f32 %v626_v4, %v613_v3 }
 0x484   :  { %v629_v43 = vadd.f32 %v624_v5, %v612_v2 }
 0x485   :  { %v641_v37 = vadd.f32 %v1412_v19, %v630_v6 }
 0x486   :  { %v640_v12 = vadd.f32 %v1405_v15, %v629_v43  ;;  %v771_v9 = vpop.permute.xlu1 %770 }
 0x487   :  { %v769_v13 = vpop.permute.xlu0 %768  ;;  %v775_v10 = vadd.f32 %v771_v9, %v758_v8 }
 0x488   :  { %v774_v18 = vadd.f32 %v769_v13, %v757_v7 }
 0x489   :  { %v786_v22 = vadd.f32 %v1430_v27, %v775_v10 }
 0x48a   :  { %v785_v41 = vadd.f32 %v1427_v26, %v774_v18  ;;  %v504_v25 = vpop.permute.xlu1 %503 }
 0x48b   :  { %v502_v30 = vpop.permute.xlu0 %501  ;;  %v508_v32 = vadd.f32 %v504_v25, %v491_v40 }
 0x48c   :  { %v507_v24 = vadd.f32 %v502_v30, %v490_v56 }
 0x48e   :  { %v654_v11 = vpop.permute.xlu1 %653 }
 0x48f   :  { %v652_v14 = vpop.permute.xlu0 %651  ;;  %v658_v35 = vadd.f32 %v654_v11, %v641_v37 }
 0x490   :  { %v657_v36 = vadd.f32 %v652_v14, %v640_v12 }
 0x492   :  { %v799_v31 = vpop.permute.xlu1 %798 }
 0x493   :  { %v797_v23 = vpop.permute.xlu0 %796  ;;  %v803_v46 = vadd.f32 %v799_v31, %v786_v22 }
 0x494   :  { %v802_v47 = vadd.f32 %v797_v23, %v785_v41 }
 0x496   :  { %v521_v33 = vpop.permute.xlu1 %520 }
 0x497   :  { %v519_v19 = vpop.permute.xlu0 %518  ;;  %v525_v34 = vadd.f32 %v521_v33, %v508_v32 }
 0x498   :  { %v524_v15 = vadd.f32 %v519_v19, %v507_v24 }
 0x499   :  { %v536_v1 = vadd.f32 %v1464_v44, %v525_v34 }
 0x49a   :  { %v535_v27 = vadd.f32 %v1467_v45, %v524_v15  ;;  %v671_v38 = vpop.permute.xlu1 %670 }
 0x49b   :  { %v669_v26 = vpop.permute.xlu0 %668  ;;  %v675_v39 = vadd.f32 %v671_v38, %v658_v35 }
 0x49c   :  { %v674_v42 = vadd.f32 %v669_v26, %v657_v36 }
 0x49d   :  { %v686_v51 = vadd.f32 %v1418_v21, %v675_v39 }
 0x49e   :  { %v685_v52 = vadd.f32 %v1415_v20, %v674_v42  ;;  %v816_v53 = vpop.permute.xlu1 %815 }
 0x49f   :  { %v814_v54 = vpop.permute.xlu0 %813  ;;  %v820_v55 = vadd.f32 %v816_v53, %v803_v46 }
 0x4a0   :  { %v819_v16 = vadd.f32 %v814_v54, %v802_v47 }
 0x4a1   :  { %v831_v56 = vadd.f32 %v1436_v29, %v820_v55 }
 0x4a2   :  { %v830_v44 = vadd.f32 %v1433_v28, %v819_v16  ;;  %v549_v17 = vpop.permute.xlu1 %548 }
 0x4a3   :  { %v547_v45 = vpop.permute.xlu0 %546  ;;  %v553_v61 = vadd.f32 %v549_v17, %v536_v1 }
 0x4a4   :  { %v552_v62 = vadd.f32 %v547_v45, %v535_v27 }
 0x4a6   :  { %v699_v57 = vpop.permute.xlu1 %698 }
 0x4a7   :  { %v697_v58 = vpop.permute.xlu0 %696  ;;  %v703_v2 = vadd.f32 %v699_v57, %v686_v51 }
 0x4a8   :  { %v702_v3 = vadd.f32 %v697_v58, %v685_v52 }
 0x4aa   :  { %v844_v59 = vpop.permute.xlu1 %843 }
 0x4ab   :  { %v842_v60 = vpop.permute.xlu0 %841  ;;  %v848_v8 = vadd.f32 %v844_v59, %v831_v56 }
 0x4ac   :  { %v847_v37 = vadd.f32 %v842_v60, %v830_v44 }
 0x4ae   :  { %v566_v63 = vpop.permute.xlu1 %565 }
 0x4af   :  { %v564_v21 = vpop.permute.xlu0 %563  ;;  %v570_v0 = vadd.f32 %v566_v63, %v553_v61 }
 0x4b0   :  { %v569_v20 = vadd.f32 %v564_v21, %v552_v62 }
 0x4b1   :  { %v581_v40 = vadd.f32 %v1551_v50, %v570_v0 }
 0x4b2   :  { %v580_v29 = vadd.f32 %v1551_v50, %v569_v20  ;;  %v716_v28 = vpop.permute.xlu1 %715 }
 0x4b3   :  { %v714_v4 = vpop.permute.xlu0 %713  ;;  %v583_v5 = vmax.f32 %v581_v40, 0.0  ;;  %v720_v43 = vadd.f32 %v716_v28, %v703_v2 }
 0x4b4   :  { %v582_v6 = vmax.f32 %v580_v29, 0.0  ;;  %v719_v7 = vadd.f32 %v714_v4, %v702_v3 }
 0x4b5   :  { %586 = vst.msk [vmem:[#allocation3 + $0x8] sm:$0xff] %vm584_vm7, %v583_v5  ;;  %v726_v12 = vadd.f32 %v1547_v48, %v720_v43 }
 0x4b6   :  { %585 = vst.msk [vmem:[#allocation3] sm:$0xff] %vm584_vm7, %v582_v6  ;;  %v725_v9 = vadd.f32 %v1547_v48, %v719_v7  ;;  %v861_v13 = vpop.permute.xlu1 %860 }
 0x4b7   :  { %v859_v10 = vpop.permute.xlu0 %858  ;;  %v728_v50 = vmax.f32 %v726_v12, 0.0  ;;  %v865_v22 = vadd.f32 %v861_v13, %v848_v8 }
 0x4b8   :  { %v727_v18 = vmax.f32 %v725_v9, 0.0  ;;  %v864_v41 = vadd.f32 %v859_v10, %v847_v37 }
 0x4b9   :  { %731 = vst.msk [vmem:[#allocation3 + $0x18] sm:$0xff] %vm584_vm7, %v728_v50  ;;  %v871_v25 = vadd.f32 %v1549_v49, %v865_v22 }
 0x4ba   :  { %730 = vst.msk [vmem:[#allocation3 + $0x10] sm:$0xff] %vm584_vm7, %v727_v18  ;;  %v870_v30 = vadd.f32 %v1549_v49, %v864_v41 }
 0x4bb   :  { %v873_v11 = vmax.f32 %v871_v25, 0.0 }
 0x4bc   :  { %v872_v14 = vmax.f32 %v870_v30, 0.0 }
 0x4bd   :  { %876 = vst.msk [vmem:[#allocation3 + $0x28] sm:$0xff] %vm584_vm7, %v873_v11 }
 0x4be   :  { %875 = vst.msk [vmem:[#allocation3 + $0x20] sm:$0xff] %vm584_vm7, %v872_v14 }
 0x4bf   :  { %1065 = shalt.err (!%p1062_p4)
}
 0x4c0   :  { %s1091_s9 = smov 128   ;;  %s1092_s6 = smov 8  }
 0x4c1   :  { %888 = dma.vmem_to_hbm [thread:$0]  %s883_s30, 768, %s1597_s10, [#allocation4], %s1091_s9, %s1091_s9, %s1092_s6  }
 0x4c2   :  { %1074 = dma.done.wait [#allocation4], 768  }
 0x4c3   :  { %1075 = vsyncadd [#allocation4], 4294966528 }
 0x4c4   :  { %892 = vsyncpa [#allocation4], 1 }

</bundles_post_ra>
